<compile_context>
chip_gen: v5e
topology: v5e:2x2
jax: 0.10.0
libtpu: 0.0.40
codegen_flags: <defaults>
</compile_context>

<pallas_src>
import functools

import jax
import jax.numpy as jnp
from jax import lax
from jax.experimental import pallas as pl
from jax.experimental.pallas import tpu as pltpu

EPS = 1e-5  # PyTorch BatchNorm1d default eps

# dot_general dims for A(m,k) . B(n,k)^T -> (m,n): contract last dims of both.
NT_DIMS = (((1,), (1,)), ((), ()))


def _cdiv(a, b):
    return -(-a // b)


def _round_up(a, b):
    return _cdiv(a, b) * b


def ventilator_mlp_kernel(x_ref, w1_ref, w2_ref, w3_ref, wh_ref,
                          b1_ref, b2_ref, b3_ref, bh_ref, out_ref,
                          *, chunk, num_chunks):
    """One batch tile, batch on the lane axis.

    x_ref:   (tile_n, input_dim)            streamed, native dtype
    w*_ref:  (out_features, in_features)    VMEM-resident (PyTorch layout)
    b*_ref:  (out_features, 1) f32          VMEM-resident
    out_ref: (out_dim, tile_n) f32          lane-dense output block
    """
    cdt = w1_ref.dtype

    # Weights / biases are tiny: load once per grid step, reuse across chunks.
    w1 = w1_ref[...]
    w2 = w2_ref[...]
    w3 = w3_ref[...]
    wh = wh_ref[...]
    b1 = b1_ref[...]
    b2 = b2_ref[...]
    b3 = b3_ref[...]
    bh = bh_ref[...]

    def body(c, carry):
        start = pl.multiple_of(c * chunk, chunk)
        # (chunk, input_dim) slice of x; cast to compute dtype in-kernel
        # (hidden under DMA/MXU) — batch rows become MXU lanes via NT contraction.
        xv = x_ref[pl.ds(start, chunk), :].astype(cdt)

        # fc1 (+BN1 folded) -> ReLU            [dropout = identity in eval mode]
        h = lax.dot_general(w1, xv, NT_DIMS, preferred_element_type=jnp.float32)
        h = jnp.maximum(h + b1, 0.0)                                # (h1, chunk)

        # fc2 (+BN2 folded) -> ReLU            [dropout = identity in eval mode]
        h = jnp.dot(w2, h.astype(cdt), preferred_element_type=jnp.float32)
        h = jnp.maximum(h + b2, 0.0)                                # (h2, chunk)

        # fc3 -> ReLU                          [dropout = identity in eval mode]
        h = jnp.dot(w3, h.astype(cdt), preferred_element_type=jnp.float32)
        h = jnp.maximum(h + b3, 0.0)                                # (h4, chunk)

        # 5 numerical heads (3 each) + mode head (2) fused:
        # rows [0:15] numerical, rows [15:17] mode.
        o = jnp.dot(wh, h.astype(cdt), preferred_element_type=jnp.float32)
        out_ref[:, pl.ds(start, chunk)] = (o + bh).astype(out_ref.dtype)
        return carry

    lax.fori_loop(0, num_chunks, body, None, unroll=True)


def init_params(key, input_dim, hidden_dim):
    """Deterministic init matching PyTorch nn.Linear / BatchNorm1d defaults.

    Weights are stored in PyTorch layout (out_features, in_features)."""
    h2, h4 = hidden_dim // 2, hidden_dim // 4

    def linear(k, fan_in, fan_out):
        kw, kb = jax.random.split(k)
        bound = 1.0 / jnp.sqrt(fan_in)
        w = jax.random.uniform(kw, (fan_out, fan_in), jnp.float32, -bound, bound)
        b = jax.random.uniform(kb, (fan_out,), jnp.float32, -bound, bound)
        return w, b

    keys = jax.random.split(key, 9)
    w1, b1 = linear(keys[0], input_dim, hidden_dim)
    w2, b2 = linear(keys[1], hidden_dim, h2)
    w3, b3 = linear(keys[2], h2, h4)

    head_ws, head_bs = [], []
    for i in range(5):
        w, b = linear(keys[3 + i], h4, 3)
        head_ws.append(w)
        head_bs.append(b)
    wm, bm = linear(keys[8], h4, 2)
    head_ws.append(wm)
    head_bs.append(bm)
    wh = jnp.concatenate(head_ws, axis=0)          # (17, h4)
    bh = jnp.concatenate(head_bs, axis=0)          # (17,)

    def bn(nf):
        return dict(g=jnp.ones((nf,), jnp.float32),
                    beta=jnp.zeros((nf,), jnp.float32),
                    rm=jnp.zeros((nf,), jnp.float32),
                    rv=jnp.ones((nf,), jnp.float32))

    return dict(w1=w1, b1=b1, bn1=bn(hidden_dim), w2=w2, b2=b2, bn2=bn(h2),
                w3=w3, b3=b3, wh=wh, bh=bh)


@functools.partial(jax.jit, static_argnames=("compute_dtype", "max_tile_n"))
def ventilator_mlp_forward(x, params, compute_dtype=jnp.float32, max_tile_n=8192):
    n, input_dim = x.shape
    h1 = params["w1"].shape[0]
    h2 = params["w2"].shape[0]
    h4 = params["w3"].shape[0]
    out_dim = params["wh"].shape[0]                # 17 = 5*3 + 2

    # ---- Fold BatchNorm1d (eval mode, running stats) into fc1 / fc2 ----------
    def fold(w, b, bn):
        scale = bn["g"] * lax.rsqrt(bn["rv"] + EPS)          # (out,)
        return w * scale[:, None], (b - bn["rm"]) * scale + bn["beta"]

    w1f, b1f = fold(params["w1"], params["b1"], params["bn1"])
    w2f, b2f = fold(params["w2"], params["b2"], params["bn2"])
    w3, b3 = params["w3"], params["b3"]
    wh, bh = params["wh"], params["bh"]

    # Weights cast in the wrapper (tiny, VMEM-resident). x is NOT pre-processed:
    # no wrapper-side astype / pad / transpose HBM pass over the batch.
    w1c, w2c, w3c, whc = (w.astype(compute_dtype) for w in (w1f, w2f, w3, wh))
    b1c = b1f.astype(jnp.float32).reshape(h1, 1)
    b2c = b2f.astype(jnp.float32).reshape(h2, 1)
    b3c = b3.astype(jnp.float32).reshape(h4, 1)
    bhc = bh.astype(jnp.float32).reshape(out_dim, 1)

    # ---- Batch tiling: batch on the lane axis of every block ------------------
    if n < 128:
        x_in = jnp.pad(x, ((0, 128 - n), (0, 0)))   # tiny, toy batches only
        n_eff = 128
    else:
        x_in = x
        n_eff = n
    # >=2 grid steps (v7x has 2 TensorCores) while keeping blocks large
    # (x block = 512 KB f32 at tile_n=8192) to amortize per-step overhead.
    tile_n = min(max_tile_n, _round_up(_cdiv(n_eff, 2), 128))
    grid = (_cdiv(n_eff, tile_n),)

    chunk = tile_n
    for c in (512, 256, 128):
        if tile_n % c == 0:
            chunk = c
            break
    num_chunks = tile_n // chunk

    kernel = functools.partial(ventilator_mlp_kernel,
                               chunk=chunk, num_chunks=num_chunks)

    w_elems = input_dim * h1 + h1 * h2 + h2 * h4 + h4 * out_dim
    cost = pl.CostEstimate(
        flops=2 * n_eff * w_elems,
        transcendentals=0,
        bytes_accessed=n_eff * (input_dim * x.dtype.itemsize + out_dim * 4)
        + w_elems * jnp.dtype(compute_dtype).itemsize,
    )

    const = lambda i: (0, 0)   # weights/biases: same block every step (resident)
    out = pl.pallas_call(
        kernel,
        out_shape=jax.ShapeDtypeStruct((out_dim, n_eff), jnp.float32),
        grid=grid,
        in_specs=[
            pl.BlockSpec((tile_n, input_dim), lambda i: (i, 0)),   # x: streamed
            pl.BlockSpec((h1, input_dim), const),                  # w1 (BN1 folded)
            pl.BlockSpec((h2, h1), const),                         # w2 (BN2 folded)
            pl.BlockSpec((h4, h2), const),                         # w3
            pl.BlockSpec((out_dim, h4), const),                    # fused heads
            pl.BlockSpec((h1, 1), const),                          # b1
            pl.BlockSpec((h2, 1), const),                          # b2
            pl.BlockSpec((h4, 1), const),                          # b3
            pl.BlockSpec((out_dim, 1), const),                     # bh
        ],
        out_specs=pl.BlockSpec((out_dim, tile_n), lambda i: (0, i)),
        compiler_params=pltpu.CompilerParams(
            dimension_semantics=("parallel",),   # shard batch tiles across TCs
        ),
        cost_estimate=cost,
    )(x_in, w1c, w2c, w3c, whc, b1c, b2c, b3c, bhc)

    # Lane-dense (17, n) kernel output -> per-head (n, k) arrays; the transpose
    # is fused by XLA into the unavoidable per-head materialization copies.
    numerical_outputs = [out[3 * i:3 * (i + 1), :n].T for i in range(5)]
    mode_output = out[15:15 + 2, :n].T
    return numerical_outputs, mode_output


def reference_forward(x, p):
    """Pure-JAX reference of the eval-mode PyTorch forward (unfolded BN)."""
    def bn(h, s):
        return (h - s["rm"]) * (s["g"] * lax.rsqrt(s["rv"] + EPS)) + s["beta"]
    h = jnp.maximum(bn(x @ p["w1"].T + p["b1"], p["bn1"]), 0.0)
    h = jnp.maximum(bn(h @ p["w2"].T + p["b2"], p["bn2"]), 0.0)
    h = jnp.maximum(h @ p["w3"].T + p["b3"], 0.0)
    out = h @ p["wh"].T + p["bh"]
    return [out[:, 3 * i:3 * (i + 1)] for i in range(5)], out[:, 15:17]


if __name__ == "__main__":
    key = jax.random.PRNGKey(0)
    k_params, k_x, k_bn = jax.random.split(key, 3)

    batch, input_dim, hidden_dim = 8, 16, 32
    params = init_params(k_params, input_dim, hidden_dim)

    # Non-trivial BN running stats / affine params so the BN-folding path is
    # actually exercised (PyTorch defaults would make BN ~identity).
    kb = jax.random.split(k_bn, 8)
    h2 = hidden_dim // 2
    params["bn1"] = dict(
        g=jax.random.uniform(kb[0], (hidden_dim,), jnp.float32, 0.8, 1.2),
        beta=0.1 * jax.random.normal(kb[1], (hidden_dim,), jnp.float32),
        rm=0.1 * jax.random.normal(kb[2], (hidden_dim,), jnp.float32),
        rv=jax.random.uniform(kb[3], (hidden_dim,), jnp.float32, 0.5, 1.5))
    params["bn2"] = dict(
        g=jax.random.uniform(kb[4], (h2,), jnp.float32, 0.8, 1.2),
        beta=0.1 * jax.random.normal(kb[5], (h2,), jnp.float32),
        rm=0.1 * jax.random.normal(kb[6], (h2,), jnp.float32),
        rv=jax.random.uniform(kb[7], (h2,), jnp.float32, 0.5, 1.5))

    x = jax.random.normal(k_x, (batch, input_dim), jnp.float32)

    # --- f32 path, tiny batch (single 128-lane block, tight tolerance) ---
    num_out, mode_out = ventilator_mlp_forward(x, params)
    jax.block_until_ready(mode_out)
    for o in num_out:
        jax.block_until_ready(o)

    ref_num, ref_mode = reference_forward(x, params)
    for a, b in zip(num_out, ref_num):
        assert a.shape == b.shape
        assert jnp.allclose(a, b, atol=1e-4, rtol=1e-4)
    assert jnp.allclose(mode_out, ref_mode, atol=1e-4, rtol=1e-4)
    assert mode_out.shape == (batch, 2)
    assert all(o.shape == (batch, 3) for o in num_out)

    # --- multi-step grid + ragged tail block: f32 and bf16 compute paths ---
    batch2 = 1000
    x2 = jax.random.normal(jax.random.PRNGKey(1), (batch2, input_dim), jnp.float32)
    ref_num2, ref_mode2 = reference_forward(x2, params)

    num2, mode2 = ventilator_mlp_forward(x2, params)
    jax.block_until_ready(mode2)
    for a, b in zip(num2, ref_num2):
        assert jnp.allclose(a, b, atol=1e-4, rtol=1e-4)
    assert jnp.allclose(mode2, ref_mode2, atol=1e-4, rtol=1e-4)

    num_bf, mode_bf = ventilator_mlp_forward(x2, params,
                                             compute_dtype=jnp.bfloat16)
    jax.block_until_ready(mode_bf)
    for a, b in zip(num_bf, ref_num2):
        assert jnp.allclose(a, b, atol=5e-2, rtol=5e-2)
    assert jnp.allclose(mode_bf, ref_mode2, atol=5e-2, rtol=5e-2)
    assert mode_bf.shape == (batch2, 2)
    assert all(o.shape == (batch2, 3) for o in num_bf)

    print("KERNEL_OK")
</pallas_src>

<mosaic_0001>
module attributes {stable_mosaic.version = 11 : i64} {
  func.func @ventilator_mlp_kernel(%arg0: i32, %arg1: memref<128x16xf32, #tpu.memory_space<vmem>>, %arg2: memref<32x16xf32, #tpu.memory_space<vmem>>, %arg3: memref<16x32xf32, #tpu.memory_space<vmem>>, %arg4: memref<8x16xf32, #tpu.memory_space<vmem>>, %arg5: memref<17x8xf32, #tpu.memory_space<vmem>>, %arg6: memref<32x1xf32, #tpu.memory_space<vmem>>, %arg7: memref<16x1xf32, #tpu.memory_space<vmem>>, %arg8: memref<8x1xf32, #tpu.memory_space<vmem>>, %arg9: memref<17x1xf32, #tpu.memory_space<vmem>>, %arg10: memref<17x128xf32, #tpu.memory_space<vmem>>) attributes {dimension_semantics = [#tpu.dimension_semantics<parallel>], iteration_bounds = array<i64: 1>, scalar_prefetch = 0 : i64, scratch_operands = 0 : i64, tpu.core_type = #tpu.core_type<tc>, window_params = [{transform_indices = @transform_0, window_bounds = array<i64: 128, 16>}, {pipeline_mode = #tpu.pipeline_mode<synchronous>, transform_indices = @transform_1, window_bounds = array<i64: 32, 16>}, {pipeline_mode = #tpu.pipeline_mode<synchronous>, transform_indices = @transform_2, window_bounds = array<i64: 16, 32>}, {pipeline_mode = #tpu.pipeline_mode<synchronous>, transform_indices = @transform_3, window_bounds = array<i64: 8, 16>}, {pipeline_mode = #tpu.pipeline_mode<synchronous>, transform_indices = @transform_4, window_bounds = array<i64: 17, 8>}, {pipeline_mode = #tpu.pipeline_mode<synchronous>, transform_indices = @transform_5, window_bounds = array<i64: 32, 1>}, {pipeline_mode = #tpu.pipeline_mode<synchronous>, transform_indices = @transform_6, window_bounds = array<i64: 16, 1>}, {pipeline_mode = #tpu.pipeline_mode<synchronous>, transform_indices = @transform_7, window_bounds = array<i64: 8, 1>}, {pipeline_mode = #tpu.pipeline_mode<synchronous>, transform_indices = @transform_8, window_bounds = array<i64: 17, 1>}, {transform_indices = @transform_9, window_bounds = array<i64: 17, 128>}]} {
    %c0 = arith.constant 0 : index
    %c0_0 = arith.constant 0 : index
    %0 = vector.load %arg2[%c0, %c0_0] : memref<32x16xf32, #tpu.memory_space<vmem>>, vector<32x16xf32>
    %c0_1 = arith.constant 0 : index
    %c0_2 = arith.constant 0 : index
    %1 = vector.load %arg3[%c0_1, %c0_2] : memref<16x32xf32, #tpu.memory_space<vmem>>, vector<16x32xf32>
    %c0_3 = arith.constant 0 : index
    %c0_4 = arith.constant 0 : index
    %2 = vector.load %arg4[%c0_3, %c0_4] : memref<8x16xf32, #tpu.memory_space<vmem>>, vector<8x16xf32>
    %c0_5 = arith.constant 0 : index
    %c0_6 = arith.constant 0 : index
    %3 = vector.load %arg5[%c0_5, %c0_6] : memref<17x8xf32, #tpu.memory_space<vmem>>, vector<17x8xf32>
    %c0_7 = arith.constant 0 : index
    %c0_8 = arith.constant 0 : index
    %4 = vector.load %arg6[%c0_7, %c0_8] : memref<32x1xf32, #tpu.memory_space<vmem>>, vector<32x1xf32>
    %c0_9 = arith.constant 0 : index
    %c0_10 = arith.constant 0 : index
    %5 = vector.load %arg7[%c0_9, %c0_10] : memref<16x1xf32, #tpu.memory_space<vmem>>, vector<16x1xf32>
    %c0_11 = arith.constant 0 : index
    %c0_12 = arith.constant 0 : index
    %6 = vector.load %arg8[%c0_11, %c0_12] : memref<8x1xf32, #tpu.memory_space<vmem>>, vector<8x1xf32>
    %c0_13 = arith.constant 0 : index
    %c0_14 = arith.constant 0 : index
    %7 = vector.load %arg9[%c0_13, %c0_14] : memref<17x1xf32, #tpu.memory_space<vmem>>, vector<17x1xf32>
    %c0_i32 = arith.constant 0 : i32
    %c128_i32 = arith.constant 128 : i32
    %8 = arith.muli %c0_i32, %c128_i32 : i32
    %9 = tpu.assume_multiple %8, 128 : i32
    %10 = arith.index_cast %9 : i32 to index
    %c0_15 = arith.constant 0 : index
    %11 = vector.load %arg1[%10, %c0_15] : memref<128x16xf32, #tpu.memory_space<vmem>>, vector<128x16xf32>
    %cst = arith.constant dense<0.000000e+00> : vector<32x128xf32>
    %12 = tpu.matmul %0, %11, %cst {dimension_numbers = #tpu.dot_dimension_numbers<[1], [1], [0], [0], [0, 0, 1, 0], [], []>} : vector<32x16xf32>, vector<128x16xf32>, vector<32x128xf32> -> vector<32x128xf32>
    %13 = vector.broadcast %4 : vector<32x1xf32> to vector<32x128xf32>
    %14 = arith.addf %12, %13 : vector<32x128xf32>
    %cst_16 = arith.constant 0.000000e+00 : f32
    %15 = vector.broadcast %cst_16 : f32 to vector<32x128xf32>
    %16 = arith.maximumf %14, %15 : vector<32x128xf32>
    %cst_17 = arith.constant dense<0.000000e+00> : vector<16x128xf32>
    %17 = tpu.matmul %1, %16, %cst_17 {dimension_numbers = #tpu.dot_dimension_numbers<[1], [0], [0], [1], [0, 0, 1, 1], [], []>} : vector<16x32xf32>, vector<32x128xf32>, vector<16x128xf32> -> vector<16x128xf32>
    %18 = vector.broadcast %5 : vector<16x1xf32> to vector<16x128xf32>
    %19 = arith.addf %17, %18 : vector<16x128xf32>
    %cst_18 = arith.constant 0.000000e+00 : f32
    %20 = vector.broadcast %cst_18 : f32 to vector<16x128xf32>
    %21 = arith.maximumf %19, %20 : vector<16x128xf32>
    %cst_19 = arith.constant dense<0.000000e+00> : vector<8x128xf32>
    %22 = tpu.matmul %2, %21, %cst_19 {dimension_numbers = #tpu.dot_dimension_numbers<[1], [0], [0], [1], [0, 0, 1, 1], [], []>} : vector<8x16xf32>, vector<16x128xf32>, vector<8x128xf32> -> vector<8x128xf32>
    %23 = vector.broadcast %6 : vector<8x1xf32> to vector<8x128xf32>
    %24 = arith.addf %22, %23 : vector<8x128xf32>
    %cst_20 = arith.constant 0.000000e+00 : f32
    %25 = vector.broadcast %cst_20 : f32 to vector<8x128xf32>
    %26 = arith.maximumf %24, %25 : vector<8x128xf32>
    %cst_21 = arith.constant dense<0.000000e+00> : vector<17x128xf32>
    %27 = tpu.matmul %3, %26, %cst_21 {dimension_numbers = #tpu.dot_dimension_numbers<[1], [0], [0], [1], [0, 0, 1, 1], [], []>} : vector<17x8xf32>, vector<8x128xf32>, vector<17x128xf32> -> vector<17x128xf32>
    %28 = vector.broadcast %7 : vector<17x1xf32> to vector<17x128xf32>
    %29 = arith.addf %27, %28 : vector<17x128xf32>
    %c0_22 = arith.constant 0 : index
    %30 = arith.index_cast %9 : i32 to index
    %31 = vector.load %arg10[%c0_22, %30] : memref<17x128xf32, #tpu.memory_space<vmem>>, vector<17x128xf32>
    tpu.vector_store %arg10[%c0_22, %30], %29 {strides = array<i32>} : memref<17x128xf32, #tpu.memory_space<vmem>>, vector<17x128xf32>,
    %c1_i32 = arith.constant 1 : i32
    return
  }
  func.func @transform_0(%arg0: i32) -> (i32, i32) {
    %c0_i32 = arith.constant 0 : i32
    %c0_i32_0 = arith.constant 0 : i32
    return %arg0, %c0_i32 : i32, i32
  }
  func.func @transform_1(%arg0: i32) -> (i32, i32) {
    %c0_i32 = arith.constant 0 : i32
    %c0_i32_0 = arith.constant 0 : i32
    %c0_i32_1 = arith.constant 0 : i32
    return %c0_i32, %c0_i32_0 : i32, i32
  }
  func.func @transform_2(%arg0: i32) -> (i32, i32) {
    %c0_i32 = arith.constant 0 : i32
    %c0_i32_0 = arith.constant 0 : i32
    %c0_i32_1 = arith.constant 0 : i32
    return %c0_i32, %c0_i32_0 : i32, i32
  }
  func.func @transform_3(%arg0: i32) -> (i32, i32) {
    %c0_i32 = arith.constant 0 : i32
    %c0_i32_0 = arith.constant 0 : i32
    %c0_i32_1 = arith.constant 0 : i32
    return %c0_i32, %c0_i32_0 : i32, i32
  }
  func.func @transform_4(%arg0: i32) -> (i32, i32) {
    %c0_i32 = arith.constant 0 : i32
    %c0_i32_0 = arith.constant 0 : i32
    %c0_i32_1 = arith.constant 0 : i32
    return %c0_i32, %c0_i32_0 : i32, i32
  }
  func.func @transform_5(%arg0: i32) -> (i32, i32) {
    %c0_i32 = arith.constant 0 : i32
    %c0_i32_0 = arith.constant 0 : i32
    %c0_i32_1 = arith.constant 0 : i32
    return %c0_i32, %c0_i32_0 : i32, i32
  }
  func.func @transform_6(%arg0: i32) -> (i32, i32) {
    %c0_i32 = arith.constant 0 : i32
    %c0_i32_0 = arith.constant 0 : i32
    %c0_i32_1 = arith.constant 0 : i32
    return %c0_i32, %c0_i32_0 : i32, i32
  }
  func.func @transform_7(%arg0: i32) -> (i32, i32) {
    %c0_i32 = arith.constant 0 : i32
    %c0_i32_0 = arith.constant 0 : i32
    %c0_i32_1 = arith.constant 0 : i32
    return %c0_i32, %c0_i32_0 : i32, i32
  }
  func.func @transform_8(%arg0: i32) -> (i32, i32) {
    %c0_i32 = arith.constant 0 : i32
    %c0_i32_0 = arith.constant 0 : i32
    %c0_i32_1 = arith.constant 0 : i32
    return %c0_i32, %c0_i32_0 : i32, i32
  }
  func.func @transform_9(%arg0: i32) -> (i32, i32) {
    %c0_i32 = arith.constant 0 : i32
    %c0_i32_0 = arith.constant 0 : i32
    return %c0_i32, %arg0 : i32, i32
  }
}

</mosaic_0001>

<bundles_post_ra>
// kernel: ventilator_mlp_forward.1
= control target key start
LH: loop header
LB: loop body
LE: loop exit
PB: predicated region body
PF: predicated region fallthrough
CT: control target
= control target key end

     0   :  { %vm88_vm0 = vcmask 130048   ;;  %v341_v11 = vmov 0   ;;  %vm192_vm1 = vcmask 261120   ;;  %vm268_vm2 = vcmask 64512   ;;  %s530_s0 = inlined_call_operand.vmem [shape: f32[128,16], index: 0, kind: input, shape index: {}]   ;;  %s531_s5 = inlined_call_operand.vmem [shape: f32[32,1], index: 5, kind: input, shape index: {}]   ;;  %s532_s7 = inlined_call_operand.vmem [shape: f32[8,1], index: 7, kind: input, shape index: {}]   ;;  %s533_s8 = inlined_call_operand.vmem [shape: f32[17,1], index: 8, kind: input, shape index: {}]   ;;  %s534_s1 = inlined_call_operand.vmem [shape: f32[32,16], index: 1, kind: input, shape index: {}]   ;;  %s535_s6 = inlined_call_operand.vmem [shape: f32[16,1], index: 6, kind: input, shape index: {}]   ;;  %s536_s2 = inlined_call_operand.vmem [shape: f32[16,32], index: 2, kind: input, shape index: {}]   ;;  %s537_s3 = inlined_call_operand.vmem [shape: f32[8,16], index: 3, kind: input, shape index: {}]   ;;  %s538_s4 = inlined_call_operand.vmem [shape: f32[17,8], index: 4, kind: input, shape index: {}]   ;;  %s539_s9 = inlined_call_operand.vmem [shape: f32[17,128], index: 9, kind: output, shape index: {}]  }
   0x1   :  { %v67_v0 = vld [vmem:[%s530_s0 + $0x78] sm:$0xff]  ;;  %v66_v1 = vld [vmem:[%s530_s0 + $0x70] sm:$0xff]  ;;  %v65_v2 = vld [vmem:[%s530_s0 + $0x68] sm:$0xff]  ;;  %339 = vset.pattern.permute.xlu1 %v341_v11  ;;  %338 = vset.pattern.permute.xlu0 %v341_v11 }
   0x2   :  { %311 = vmatpush.xpose.msk.msra.mxu0 %vm88_vm0, %v67_v0  ;;  %v64_v3 = vld [vmem:[%s530_s0 + $0x60] sm:$0xff]  ;;  %v63_v4 = vld [vmem:[%s530_s0 + $0x58] sm:$0xff]  ;;  %v62_v5 = vld [vmem:[%s530_s0 + $0x50] sm:$0xff]  ;;  %340 = vset.pattern.permute.xlu2 %v341_v11 }
   0x3   :  { %v61_v6 = vld [vmem:[%s530_s0 + $0x48] sm:$0xff]  ;;  %v60_v7 = vld [vmem:[%s530_s0 + $0x40] sm:$0xff]  ;;  %v59_v8 = vld [vmem:[%s530_s0 + $0x38] sm:$0xff] }
   0x4   :  { %v43_v9 = vld [vmem:[%s531_s5 + $0x8] sm:$0xff]  ;;  %v45_v10 = vld [vmem:[%s531_s5 + $0x18] sm:$0xff]  ;;  %v58_v12 = vld [vmem:[%s530_s0 + $0x30] sm:$0xff] }
   0x5   :  { %75 = vperm.xlu1 %339, %v43_v9   ;;  %85 = vperm.xlu0 %338, %v45_v10   ;;  %v57_v13 = vld [vmem:[%s530_s0 + $0x28] sm:$0xff]  ;;  %v42_v14 = vld [vmem:[%s531_s5] sm:$0xff]  ;;  %v44_v15 = vld [vmem:[%s531_s5 + $0x10] sm:$0xff] }
   0x6   :  { %312 = vmatpush.xpose.msk.msra.mxu0 %vm88_vm0, %v66_v1  ;;  %v56_v16 = vld [vmem:[%s530_s0 + $0x20] sm:$0xff]  ;;  %v55_v17 = vld [vmem:[%s530_s0 + $0x18] sm:$0xff]  ;;  %v54_v19 = vld [vmem:[%s530_s0 + $0x10] sm:$0xff] }
   0x7   :  { %v48_v18 = vld [vmem:[%s532_s7] sm:$0xff]  ;;  %v53_v20 = vld [vmem:[%s530_s0 + $0x8] sm:$0xff]  ;;  %v51_v21 = vld [vmem:[%s533_s8 + $0x10] sm:$0x1] }
   0x8   :  { %v49_v22 = vld [vmem:[%s533_s8] sm:$0xff]  ;;  %v33_v25 = vld [vmem:[%s534_s1 + $0x8] sm:$0xff]  ;;  %v34_v26 = vld [vmem:[%s534_s1 + $0x10] sm:$0xff] }
   0x9   :  { %v52_v23 = vld [vmem:[%s530_s0] sm:$0xff]  ;;  %v35_v27 = vld [vmem:[%s534_s1 + $0x18] sm:$0xff]  ;;  %v47_v30 = vld [vmem:[%s535_s6 + $0x8] sm:$0xff] }
   0xa   :  { %313 = vmatpush.xpose.msk.msra.mxu0 %vm88_vm0, %v65_v2  ;;  %v32_v24 = vld [vmem:[%s534_s1] sm:$0xff]  ;;  %189 = vperm.xlu2 %340, %v47_v30   ;;  %v50_v40 = vld [vmem:[%s533_s8 + $0x8] sm:$0xff]  ;;  %v41_v0 = vld [vmem:[%s538_s4 + $0x10] sm:$0x1] }
   0xb   :  { %v46_v34 = vld [vmem:[%s535_s6] sm:$0xff]  ;;  %v37_v48 = vld [vmem:[%s536_s2 + $0x8] sm:$0xff] }
   0xc   :  { %v36_v47 = vld [vmem:[%s536_s2] sm:$0xff]  ;;  %v40_v63 = vld [vmem:[%s538_s4 + $0x8] sm:$0xff] }
   0xd   :  { %70 = vperm.xlu1 %339, %v42_v14   ;;  %80 = vperm.xlu0 %338, %v44_v15   ;;  %v38_v57 = vld [vmem:[%s537_s3] sm:$0xff] }
   0xe   :  { %314 = vmatpush.xpose.msk.msra.mxu0 %vm88_vm0, %v64_v3  ;;  %v39_v62 = vld [vmem:[%s538_s4] sm:$0xff] }
  0x12   :  { %315 = vmatpush.xpose.msk.msra.mxu0 %vm88_vm0, %v63_v4  ;;  %184 = vperm.xlu2 %340, %v46_v34  }
  0x15   :  { %226 = vperm.xlu0 %338, %v48_v18   ;;  %255 = vperm.xlu1 %339, %v49_v22  }
  0x16   :  { %316 = vmatpush.xpose.msk.msra.mxu0 %vm88_vm0, %v62_v5 }
  0x1a   :  { %317 = vmatpush.xpose.msk.msra.mxu0 %vm88_vm0, %v61_v6  ;;  %260 = vperm.xlu2 %340, %v50_v40  }
  0x1d   :  { %265 = vperm.xlu0 %338, %v51_v21  }
  0x1e   :  { %318 = vmatpush.xpose.msk.msra.mxu0 %vm88_vm0, %v60_v7 }
  0x22   :  { %319 = vmatpush.xpose.msk.msra.mxu0 %vm88_vm0, %v59_v8 }
  0x26   :  { %320 = vmatpush.xpose.msk.msra.mxu0 %vm88_vm0, %v58_v12 }
  0x2a   :  { %321 = vmatpush.xpose.msk.msra.mxu0 %vm88_vm0, %v57_v13 }
  0x2e   :  { %322 = vmatpush.xpose.msk.msra.mxu0 %vm88_vm0, %v56_v16 }
  0x32   :  { %323 = vmatpush.xpose.msk.msra.mxu0 %vm88_vm0, %v55_v17 }
  0x36   :  { %324 = vmatpush.xpose.msk.msra.mxu0 %vm88_vm0, %v54_v19 }
  0x3a   :  { %325 = vmatpush.xpose.msk.msra.mxu0 %vm88_vm0, %v53_v20 }
  0x3e   :  { %326 = vmatpush.xpose.msk.msra.mxu0 %vm88_vm0, %v52_v23 }
  0x41   :  { %327 = vmatmul.msk.f32.vlgmr.msra.gmra.mxu0 %vm88_vm0, %v32_v24 }
  0x49   :  { %328 = vmatmul.msk.f32.gmra.mxu0 %vm88_vm0, %v33_v25 }
  0x51   :  { %329 = vmatmul.msk.f32.gmra.mxu0 %vm88_vm0, %v34_v26 }
  0x59   :  { %330 = vmatmul.msk.f32.gmra.mxu0 %vm88_vm0, %v35_v27 }
  0x64   :  { %v190_v49 = vpop.permute.xlu2 %189 }
  0x6c   :  { %v185_v51 = vpop.permute.xlu2 %184 }
  0x74   :  { %v261_v4 = vpop.permute.xlu2 %260 }
  0x77   :  { %v86_v31 = vpop.permute.xlu0 %85  ;;  %v76_v32 = vpop.permute.xlu1 %75 }
  0x7f   :  { %v81_v35 = vpop.permute.xlu0 %80  ;;  %v71_v39 = vpop.permute.xlu1 %70 }
  0x87   :  { %v227_v58 = vpop.permute.xlu0 %226  ;;  %v256_v1 = vpop.permute.xlu1 %255 }
  0x8f   :  { %v266_v7 = vpop.permute.xlu0 %265 }
  0xbe   :  { %v166_v28 = vpop.f32.mrf.mxu0 }
  0xbf   :  { %v167_v43 = vadd.f32 %v166_v28, %v71_v39 }
  0xc1   :  { %v178_v46 = vmax.f32 %v167_v43, 0.0 }
  0xc6   :  { %v169_v29 = vpop.f32.mrf.mxu0 }
  0xc7   :  { %v170_v41 = vadd.f32 %v169_v29, %v76_v32 }
  0xc9   :  { %v179_v45 = vmax.f32 %v170_v41, 0.0 }
  0xce   :  { %v172_v33 = vpop.f32.mrf.mxu0 }
  0xcf   :  { %v173_v37 = vadd.f32 %v172_v33, %v81_v35 }
  0xd1   :  { %v180_v44 = vmax.f32 %v173_v37, 0.0 }
  0xd6   :  { %v175_v36 = vpop.f32.mrf.mxu0 }
  0xd7   :  { %v176_v38 = vadd.f32 %v175_v36, %v86_v31 }
  0xd9   :  { %v181_v42 = vmax.f32 %v176_v38, 0.0 }
  0xdb   :  { %211 = vmatpush.msra.mxu1 %v181_v42 }
  0xdd   :  { %212 = vmatpush.msra.mxu1 %v180_v44 }
  0xdf   :  { %213 = vmatpush.msra.mxu1 %v179_v45 }
  0xe1   :  { %214 = vmatpush.msra.mxu1 %v178_v46 }
  0xe2   :  { %331 = vmatmul.msk.f32.vlgmr.msra.gmra.mxu1 %vm192_vm1, %v36_v47 }
  0xea   :  { %332 = vmatmul.msk.f32.gmra.mxu1 %vm192_vm1, %v37_v48 }
 0x15f   :  { %v216_v50 = vpop.f32.mrf.mxu1 }
 0x160   :  { %v217_v53 = vadd.f32 %v216_v50, %v185_v51 }
 0x162   :  { %v222_v56 = vmax.f32 %v217_v53, 0.0 }
 0x167   :  { %v219_v52 = vpop.f32.mrf.mxu1 }
 0x168   :  { %v220_v54 = vadd.f32 %v219_v52, %v190_v49 }
 0x16a   :  { %v223_v55 = vmax.f32 %v220_v54, 0.0 }
 0x16c   :  { %246 = vmatpush.msra.mxu2 %v223_v55 }
 0x16e   :  { %247 = vmatpush.msra.mxu2 %v222_v56 }
 0x16f   :  { %333 = vmatmul.msk.f32.vlgmr.msra.gmra.mxu2 %vm88_vm0, %v38_v57 }
 0x1f2   :  { %v249_v59 = vpop.f32.mrf.mxu2 }
 0x1f3   :  { %v250_v60 = vadd.f32 %v249_v59, %v227_v58 }
 0x1f5   :  { %v252_v61 = vmax.f32 %v250_v60, 0.0 }
 0x1f7   :  { %293 = vmatpush.msra.mxu3 %v252_v61 }
 0x1f8   :  { %334 = vmatmul.msk.f32.vlgmr.msra.gmra.mxu3 %vm268_vm2, %v39_v62 }
 0x200   :  { %335 = vmatmul.msk.f32.gmra.mxu3 %vm268_vm2, %v40_v63 }
 0x208   :  { %336 = vmatmul.msk.f32.gmra.mxu3 %vm268_vm2, %v41_v0 }
 0x27b   :  { %v295_v2 = vpop.f32.mrf.mxu3 }
 0x27c   :  { %v296_v3 = vadd.f32 %v295_v2, %v256_v1 }
 0x27e   :  { %304 = vst [vmem:[%s539_s9] sm:$0xff] %v296_v3 }
 0x283   :  { %v298_v5 = vpop.f32.mrf.mxu3 }
 0x284   :  { %v299_v6 = vadd.f32 %v298_v5, %v261_v4 }
 0x286   :  { %305 = vst [vmem:[%s539_s9 + $0x8] sm:$0xff] %v299_v6 }
 0x28b   :  { %v301_v8 = vpop.f32.mrf.mxu3 }
 0x28c   :  { %v302_v9 = vadd.f32 %v301_v8, %v266_v7 }
 0x28e   :  { %306 = vst [vmem:[%s539_s9 + $0x10] sm:$0x1] %v302_v9 }

</bundles_post_ra>
